<compile_context>
chip_gen: v7x
topology: tpu7x:2x2x1
jax: 0.10.0
libtpu: 0.0.40
codegen_flags: <defaults>
</compile_context>

<pallas_src>
import functools

import jax
import jax.numpy as jnp
from jax.experimental import pallas as pl
from jax.experimental.pallas import tpu as pltpu

# Model hyper-parameters (from Net.__init__ defaults)
EMB_DIM = 100
FIX_LENGTH = 32
IN_DIM = EMB_DIM * FIX_LENGTH          # 3200
HIDDEN = 128
NUM_CLASSES = 2
OUT_PAD = 128                          # lane-dense padded output width
VOCAB_SIZE = 1000                      # stand-in for len(TEXT.vocab)
LEAKY_SLOPE = 0.01                     # nn.LeakyReLU default negative_slope


def mlp_kernel(x_ref, w1_ref, b1_ref, w2_ref, b2_ref, o_ref):
    """Fused: out = leaky_relu(x @ W1 + b1) @ W2pad + b2pad (f32 accumulation)."""
    # Layer 1: bf16 activations x bf16 weights -> f32 accumulate on the MXU.
    h = jnp.dot(x_ref[...], w1_ref[...],
                preferred_element_type=jnp.float32)        # [TB, 128] f32
    h = h + b1_ref[...]                                    # bias [1, 128]
    h = jnp.where(h > 0, h, LEAKY_SLOPE * h)               # LeakyReLU
    # Layer 2: tiny, kept in f32, lane-dense (padded to 128 output columns).
    o = jnp.dot(h, w2_ref[...], preferred_element_type=jnp.float32)
    o_ref[...] = o + b2_ref[...]                           # [TB, 128] f32


def net_forward(texts, emb_table, w1, b1, w2, b2, *, block_b=512):
    """texts: int32 [B, FIX_LENGTH] token ids -> f32 [B, NUM_CLASSES]."""
    B = texts.shape[0]

    # Embedding lookup + flatten (pure gather/reshape, no FLOPs), then cast to
    # bf16 so the kernel streams half the activation bytes.
    flat = jnp.take(emb_table, texts, axis=0).reshape(B, IN_DIM)
    flat = flat.astype(jnp.bfloat16)

    # Batch tile: multiple of 8 (f32/bf16 sublane-safe), capped for v7x VMEM.
    tb = min(block_b, max(8, ((B + 7) // 8) * 8))
    b_pad = ((B + tb - 1) // tb) * tb
    if b_pad != B:
        flat = jnp.pad(flat, ((0, b_pad - B), (0, 0)))

    # bf16 weight stream for layer 1; biases stay f32.
    w1_bf16 = w1.astype(jnp.bfloat16)
    b1_f32 = b1.astype(jnp.float32)

    # Lane-dense second layer: zero-pad (128, 2) -> (128, 128), (1, 2) -> (1, 128).
    w2p = jnp.zeros((HIDDEN, OUT_PAD), jnp.float32).at[:, :NUM_CLASSES].set(w2)
    b2p = jnp.zeros((1, OUT_PAD), jnp.float32).at[:, :NUM_CLASSES].set(b2)

    grid = (b_pad // tb,)
    cost = pl.CostEstimate(
        flops=2 * b_pad * IN_DIM * HIDDEN + 2 * b_pad * HIDDEN * OUT_PAD,
        transcendentals=0,
        bytes_accessed=(b_pad * IN_DIM * 2            # bf16 activations in
                        + IN_DIM * HIDDEN * 2         # bf16 W1
                        + HIDDEN * OUT_PAD * 4        # f32 W2 (padded)
                        + (HIDDEN + OUT_PAD) * 4      # biases
                        + b_pad * OUT_PAD * 4),       # f32 output
    )

    out = pl.pallas_call(
        mlp_kernel,
        out_shape=jax.ShapeDtypeStruct((b_pad, OUT_PAD), jnp.float32),
        grid_spec=pltpu.PrefetchScalarGridSpec(
            num_scalar_prefetch=0,
            grid=grid,
            in_specs=[
                # Activations: tiled over the batch -> double-buffered DMA.
                pl.BlockSpec((tb, IN_DIM), lambda i: (i, 0)),
                # Weights/biases: same block every step -> VMEM-resident.
                pl.BlockSpec((IN_DIM, HIDDEN), lambda i: (0, 0)),
                pl.BlockSpec((1, HIDDEN), lambda i: (0, 0)),
                pl.BlockSpec((HIDDEN, OUT_PAD), lambda i: (0, 0)),
                pl.BlockSpec((1, OUT_PAD), lambda i: (0, 0)),
            ],
            out_specs=pl.BlockSpec((tb, OUT_PAD), lambda i: (i, 0)),
        ),
        compiler_params=pltpu.CompilerParams(
            dimension_semantics=("parallel",)),
        cost_estimate=cost,
    )(flat, w1_bf16, b1_f32, w2p, b2p)

    return out[:B, :NUM_CLASSES]


def init_params(key):
    k_emb, k_w1, k_b1, k_w2, k_b2 = jax.random.split(key, 5)
    # nn.Embedding: N(0, 1); nn.Linear: U(-1/sqrt(fan_in), 1/sqrt(fan_in)).
    emb_table = jax.random.normal(k_emb, (VOCAB_SIZE, EMB_DIM), jnp.float32)
    lim1 = 1.0 / jnp.sqrt(IN_DIM)
    w1 = jax.random.uniform(k_w1, (IN_DIM, HIDDEN), jnp.float32, -lim1, lim1)
    b1 = jax.random.uniform(k_b1, (1, HIDDEN), jnp.float32, -lim1, lim1)
    lim2 = 1.0 / jnp.sqrt(HIDDEN)
    w2 = jax.random.uniform(k_w2, (HIDDEN, NUM_CLASSES), jnp.float32, -lim2, lim2)
    b2 = jax.random.uniform(k_b2, (1, NUM_CLASSES), jnp.float32, -lim2, lim2)
    return emb_table, w1, b1, w2, b2


if __name__ == "__main__":
    key = jax.random.PRNGKey(0)
    params = init_params(key)

    B = 8
    texts = jax.random.randint(jax.random.PRNGKey(0), (B, FIX_LENGTH),
                               0, VOCAB_SIZE, dtype=jnp.int32)

    fwd = jax.jit(functools.partial(net_forward, block_b=512))
    out = fwd(texts, *params)
    out = jax.block_until_ready(out)

    # Reference check in plain JAX (f32 math; kernel uses bf16 inputs with f32
    # accumulation, so compare with a loose tolerance).
    emb_table, w1, b1, w2, b2 = params
    flat = jnp.take(emb_table, texts, axis=0).reshape(B, -1)
    h = flat @ w1 + b1
    h = jnp.where(h > 0, h, LEAKY_SLOPE * h)
    ref = h @ w2 + b2

    assert out.shape == (B, NUM_CLASSES)
    assert jnp.allclose(out, ref, atol=3e-2, rtol=3e-2)

    print("KERNEL_OK")
</pallas_src>

<mosaic_0001>
module attributes {stable_mosaic.version = 11 : i64} {
  func.func @mlp_kernel(%arg0: i32, %arg1: memref<8x3200xbf16, #tpu.memory_space<vmem>>, %arg2: memref<3200x128xbf16, #tpu.memory_space<vmem>>, %arg3: memref<1x128xf32, #tpu.memory_space<vmem>>, %arg4: memref<128x128xf32, #tpu.memory_space<vmem>>, %arg5: memref<1x128xf32, #tpu.memory_space<vmem>>, %arg6: memref<8x128xf32, #tpu.memory_space<vmem>>) attributes {dimension_semantics = [#tpu.dimension_semantics<parallel>], iteration_bounds = array<i64: 1>, scalar_prefetch = 0 : i64, scratch_operands = 0 : i64, tpu.core_type = #tpu.core_type<tc>, window_params = [{transform_indices = @transform_0, window_bounds = array<i64: 8, 3200>}, {pipeline_mode = #tpu.pipeline_mode<synchronous>, transform_indices = @transform_1, window_bounds = array<i64: 3200, 128>}, {pipeline_mode = #tpu.pipeline_mode<synchronous>, transform_indices = @transform_2, window_bounds = array<i64: 1, 128>}, {pipeline_mode = #tpu.pipeline_mode<synchronous>, transform_indices = @transform_3, window_bounds = array<i64: 128, 128>}, {pipeline_mode = #tpu.pipeline_mode<synchronous>, transform_indices = @transform_4, window_bounds = array<i64: 1, 128>}, {transform_indices = @transform_5, window_bounds = array<i64: 8, 128>}]} {
    %c0 = arith.constant 0 : index
    %c0_0 = arith.constant 0 : index
    %0 = vector.load %arg1[%c0, %c0_0] : memref<8x3200xbf16, #tpu.memory_space<vmem>>, vector<8x3200xbf16>
    %c0_1 = arith.constant 0 : index
    %c0_2 = arith.constant 0 : index
    %1 = vector.load %arg2[%c0_1, %c0_2] : memref<3200x128xbf16, #tpu.memory_space<vmem>>, vector<3200x128xbf16>
    %cst = arith.constant dense<0.000000e+00> : vector<8x128xf32>
    %2 = tpu.matmul %0, %1, %cst {dimension_numbers = #tpu.dot_dimension_numbers<[1], [0], [0], [1], [0, 0, 1, 1], [], []>} : vector<8x3200xbf16>, vector<3200x128xbf16>, vector<8x128xf32> -> vector<8x128xf32>
    %c0_3 = arith.constant 0 : index
    %c0_4 = arith.constant 0 : index
    %3 = vector.load %arg3[%c0_3, %c0_4] : memref<1x128xf32, #tpu.memory_space<vmem>>, vector<1x128xf32>
    %4 = vector.broadcast %3 : vector<1x128xf32> to vector<8x128xf32>
    %5 = arith.addf %2, %4 : vector<8x128xf32>
    %cst_5 = arith.constant 0.000000e+00 : f32
    %6 = vector.broadcast %cst_5 : f32 to vector<8x128xf32>
    %7 = arith.cmpf ogt, %5, %6 : vector<8x128xf32>
    %cst_6 = arith.constant 0.00999999977 : f32
    %8 = vector.broadcast %cst_6 : f32 to vector<8x128xf32>
    %9 = arith.mulf %8, %5 : vector<8x128xf32>
    %10 = arith.select %7, %5, %9 : vector<8x128xi1>, vector<8x128xf32>
    %c0_7 = arith.constant 0 : index
    %c0_8 = arith.constant 0 : index
    %11 = vector.load %arg4[%c0_7, %c0_8] : memref<128x128xf32, #tpu.memory_space<vmem>>, vector<128x128xf32>
    %cst_9 = arith.constant dense<0.000000e+00> : vector<8x128xf32>
    %12 = tpu.matmul %10, %11, %cst_9 {dimension_numbers = #tpu.dot_dimension_numbers<[1], [0], [0], [1], [0, 0, 1, 1], [], []>} : vector<8x128xf32>, vector<128x128xf32>, vector<8x128xf32> -> vector<8x128xf32>
    %c0_10 = arith.constant 0 : index
    %c0_11 = arith.constant 0 : index
    %13 = vector.load %arg5[%c0_10, %c0_11] : memref<1x128xf32, #tpu.memory_space<vmem>>, vector<1x128xf32>
    %14 = vector.broadcast %13 : vector<1x128xf32> to vector<8x128xf32>
    %15 = arith.addf %12, %14 : vector<8x128xf32>
    %c0_12 = arith.constant 0 : index
    %c0_13 = arith.constant 0 : index
    %16 = vector.load %arg6[%c0_12, %c0_13] : memref<8x128xf32, #tpu.memory_space<vmem>>, vector<8x128xf32>
    tpu.vector_store %arg6[%c0_12, %c0_13], %15 {strides = array<i32>} : memref<8x128xf32, #tpu.memory_space<vmem>>, vector<8x128xf32>,
    return
  }
  func.func @transform_0(%arg0: i32) -> (i32, i32) {
    %c0_i32 = arith.constant 0 : i32
    %c0_i32_0 = arith.constant 0 : i32
    return %arg0, %c0_i32 : i32, i32
  }
  func.func @transform_1(%arg0: i32) -> (i32, i32) {
    %c0_i32 = arith.constant 0 : i32
    %c0_i32_0 = arith.constant 0 : i32
    %c0_i32_1 = arith.constant 0 : i32
    return %c0_i32, %c0_i32_0 : i32, i32
  }
  func.func @transform_2(%arg0: i32) -> (i32, i32) {
    %c0_i32 = arith.constant 0 : i32
    %c0_i32_0 = arith.constant 0 : i32
    %c0_i32_1 = arith.constant 0 : i32
    return %c0_i32, %c0_i32_0 : i32, i32
  }
  func.func @transform_3(%arg0: i32) -> (i32, i32) {
    %c0_i32 = arith.constant 0 : i32
    %c0_i32_0 = arith.constant 0 : i32
    %c0_i32_1 = arith.constant 0 : i32
    return %c0_i32, %c0_i32_0 : i32, i32
  }
  func.func @transform_4(%arg0: i32) -> (i32, i32) {
    %c0_i32 = arith.constant 0 : i32
    %c0_i32_0 = arith.constant 0 : i32
    %c0_i32_1 = arith.constant 0 : i32
    return %c0_i32, %c0_i32_0 : i32, i32
  }
  func.func @transform_5(%arg0: i32) -> (i32, i32) {
    %c0_i32 = arith.constant 0 : i32
    %c0_i32_0 = arith.constant 0 : i32
    return %arg0, %c0_i32 : i32, i32
  }
}

</mosaic_0001>

<bundles_post_ra>
// kernel: net_forward.1
= control target key start
LH: loop header
LB: loop body
LE: loop exit
PB: predicated region body
PF: predicated region fallthrough
CT: control target
= control target key end

     0   :  { %vm3175_vm0 = vmmov 0   ;;  %s3903_s1 = inlined_call_operand.vmem [shape: bf16[3200,128], index: 1, kind: input, shape index: {}]   ;;  %s3904_s0 = inlined_call_operand.vmem [shape: bf16[8,3200], index: 0, kind: input, shape index: {}]   ;;  %s3905_s2 = inlined_call_operand.vmem [shape: f32[1,128], index: 2, kind: input, shape index: {}]   ;;  %s3906_s3 = inlined_call_operand.vmem [shape: f32[128,128], index: 3, kind: input, shape index: {}]   ;;  %s3907_s4 = inlined_call_operand.vmem [shape: f32[1,128], index: 4, kind: input, shape index: {}]   ;;  %s3908_s5 = inlined_call_operand.vmem [shape: f32[8,128], index: 5, kind: output, shape index: {}]  }
   0x1   :  { %v2949_v0 = vld [vmem:[%s3903_s1 + $0x40] sm:$0xff]   ;;  %v2953_v4 = vld [vmem:[%s3903_s1 + $0x48] sm:$0xff]   ;;  %v2957_v8 = vld [vmem:[%s3903_s1 + $0x50] sm:$0xff]  }
   0x2   :  { %v2950_v1 = vld [vmem:[%s3903_s1] sm:$0xff]   ;;  %2577 = vmatprep.subr.bf16.mxu0 %v2949_v0  ;;  %v2954_v5 = vld [vmem:[%s3903_s1 + $0x8] sm:$0xff]   ;;  %v2958_v9 = vld [vmem:[%s3903_s1 + $0x10] sm:$0xff]  }
   0x3   :  { %v2951_v2 = vld [vmem:[%s3903_s1 + $0xc0] sm:$0xff]   ;;  %2578 = vmatpush3.bf16.msra.mxu0 %v2950_v1  ;;  %v2955_v6 = vld [vmem:[%s3903_s1 + $0xc8] sm:$0xff]   ;;  %v2959_v10 = vld [vmem:[%s3903_s1 + $0xd0] sm:$0xff]  }
   0x4   :  { %v2952_v3 = vld [vmem:[%s3903_s1 + $0x80] sm:$0xff]   ;;  %2599 = vmatprep.subr.bf16.mxu1 %v2951_v2  ;;  %2579 = vmatprep.subr.bf16.mxu0 %v2953_v4  ;;  %v2956_v7 = vld [vmem:[%s3903_s1 + $0x88] sm:$0xff]   ;;  %v2960_v11 = vld [vmem:[%s3903_s1 + $0x90] sm:$0xff]  }
   0x5   :  { %2600 = vmatpush3.bf16.msra.mxu1 %v2952_v3  ;;  %v2961_v12 = vld [vmem:[%s3903_s1 + $0x58] sm:$0xff]   ;;  %v2965_v16 = vld [vmem:[%s3903_s1 + $0x60] sm:$0xff]   ;;  %v2969_v20 = vld [vmem:[%s3903_s1 + $0x68] sm:$0xff]  }
   0x6   :  { %2601 = vmatprep.subr.bf16.mxu1 %v2955_v6  ;;  %v2962_v13 = vld [vmem:[%s3903_s1 + $0x18] sm:$0xff]   ;;  %v2966_v17 = vld [vmem:[%s3903_s1 + $0x20] sm:$0xff]   ;;  %v2970_v21 = vld [vmem:[%s3903_s1 + $0x28] sm:$0xff]  }
   0x7   :  { %2580 = vmatpush3.bf16.msra.mxu0 %v2954_v5  ;;  %v2963_v14 = vld [vmem:[%s3903_s1 + $0xd8] sm:$0xff]   ;;  %v2967_v18 = vld [vmem:[%s3903_s1 + $0xe0] sm:$0xff]   ;;  %v2971_v22 = vld [vmem:[%s3903_s1 + $0xe8] sm:$0xff]  }
   0x8   :  { %2581 = vmatprep.subr.bf16.mxu0 %v2957_v8  ;;  %v2964_v15 = vld [vmem:[%s3903_s1 + $0x98] sm:$0xff]   ;;  %v2968_v19 = vld [vmem:[%s3903_s1 + $0xa0] sm:$0xff]   ;;  %v2972_v23 = vld [vmem:[%s3903_s1 + $0xa8] sm:$0xff]  }
   0x9   :  { %2602 = vmatpush3.bf16.msra.mxu1 %v2956_v7  ;;  %v2973_v24 = vld [vmem:[%s3903_s1 + $0x70] sm:$0xff]   ;;  %v2977_v28 = vld [vmem:[%s3903_s1 + $0x78] sm:$0xff]   ;;  %v21_v31 = vld [vmem:[%s3904_s0] sm:$0xff] }
   0xa   :  { %2603 = vmatprep.subr.bf16.mxu1 %v2959_v10  ;;  %v2974_v25 = vld [vmem:[%s3903_s1 + $0x30] sm:$0xff]   ;;  %v2978_v29 = vld [vmem:[%s3903_s1 + $0x38] sm:$0xff]   ;;  %v2351_v32 = vcombine.low %v21_v31, %v21_v31  ;;  %v2352_v33 = vcombine.high %v21_v31, %v21_v31  ;;  %v2983_v35 = vld [vmem:[%s3903_s1 + $0x140] sm:$0xff]  }
   0xb   :  { %2582 = vmatpush3.bf16.msra.mxu0 %v2958_v9  ;;  %v2975_v26 = vld [vmem:[%s3903_s1 + $0xf0] sm:$0xff]   ;;  %v2979_v30 = vld [vmem:[%s3903_s1 + $0xf8] sm:$0xff]   ;;  %v22_v36 = vld [vmem:[%s3904_s0 + $0x8] sm:$0xff] }
   0xc   :  { %2583 = vmatprep.subr.bf16.mxu0 %v2961_v12  ;;  %v2976_v27 = vld [vmem:[%s3903_s1 + $0xb0] sm:$0xff]   ;;  %v2982_v34 = vld [vmem:[%s3903_s1 + $0xb8] sm:$0xff]   ;;  %1761 = vmatprep.mubr.bf16.mxu0 %v2352_v33  ;;  %v2353_v37 = vcombine.low %v22_v36, %v22_v36  ;;  %v2354_v38 = vcombine.high %v22_v36, %v22_v36  ;;  %v2986_v39 = vld [vmem:[%s3903_s1 + $0x100] sm:$0xff]  }
   0xd   :  { %2604 = vmatpush3.bf16.msra.mxu1 %v2960_v11  ;;  %v2987_v40 = vld [vmem:[%s3903_s1 + $0x1c0] sm:$0xff]   ;;  %v2989_v42 = vld [vmem:[%s3903_s1 + $0x148] sm:$0xff]   ;;  %v2993_v46 = vld [vmem:[%s3903_s1 + $0x150] sm:$0xff]  }
   0xe   :  { %2605 = vmatprep.subr.bf16.mxu1 %v2963_v14  ;;  %1801 = vmatprep.mubr.bf16.mxu1 %v2354_v38  ;;  %v2988_v41 = vld [vmem:[%s3903_s1 + $0x180] sm:$0xff]   ;;  %v2990_v43 = vld [vmem:[%s3903_s1 + $0x108] sm:$0xff]   ;;  %v2994_v47 = vld [vmem:[%s3903_s1 + $0x110] sm:$0xff]  }
   0xf   :  { %2584 = vmatpush3.bf16.msra.mxu0 %v2962_v13  ;;  %v2991_v44 = vld [vmem:[%s3903_s1 + $0x1c8] sm:$0xff]   ;;  %v2995_v48 = vld [vmem:[%s3903_s1 + $0x1d0] sm:$0xff]   ;;  %v2997_v50 = vld [vmem:[%s3903_s1 + $0x158] sm:$0xff]  }
  0x10   :  { %2585 = vmatprep.subr.bf16.mxu0 %v2965_v16  ;;  %v2992_v45 = vld [vmem:[%s3903_s1 + $0x188] sm:$0xff]   ;;  %v2996_v49 = vld [vmem:[%s3903_s1 + $0x190] sm:$0xff]   ;;  %v2998_v51 = vld [vmem:[%s3903_s1 + $0x118] sm:$0xff]  }
  0x11   :  { %2606 = vmatpush3.bf16.msra.mxu1 %v2964_v15  ;;  %v2999_v52 = vld [vmem:[%s3903_s1 + $0x1d8] sm:$0xff]   ;;  %v3001_v54 = vld [vmem:[%s3903_s1 + $0x160] sm:$0xff]   ;;  %v3005_v58 = vld [vmem:[%s3903_s1 + $0x168] sm:$0xff]  }
  0x12   :  { %2607 = vmatprep.subr.bf16.mxu1 %v2967_v18  ;;  %v3000_v53 = vld [vmem:[%s3903_s1 + $0x198] sm:$0xff]   ;;  %v3002_v55 = vld [vmem:[%s3903_s1 + $0x120] sm:$0xff]   ;;  %v3006_v59 = vld [vmem:[%s3903_s1 + $0x128] sm:$0xff]  }
  0x13   :  { %2586 = vmatpush3.bf16.msra.mxu0 %v2966_v17  ;;  %v3003_v56 = vld [vmem:[%s3903_s1 + $0x1e0] sm:$0xff]   ;;  %v3007_v60 = vld [vmem:[%s3903_s1 + $0x1e8] sm:$0xff]   ;;  %v3009_v62 = vld [vmem:[%s3903_s1 + $0x170] sm:$0xff]  }
  0x14   :  { %2587 = vmatprep.subr.bf16.mxu0 %v2969_v20  ;;  %v3004_v57 = vld [vmem:[%s3903_s1 + $0x1a0] sm:$0xff]   ;;  %v3008_v61 = vld [vmem:[%s3903_s1 + $0x1a8] sm:$0xff]   ;;  %v3010_v63 = vld [vmem:[%s3903_s1 + $0x130] sm:$0xff]  }
  0x15   :  { %2608 = vmatpush3.bf16.msra.mxu1 %v2968_v19  ;;  %v3011_v0 = vld [vmem:[%s3903_s1 + $0x1f0] sm:$0xff]   ;;  %v3013_v2 = vld [vmem:[%s3903_s1 + $0x178] sm:$0xff]   ;;  %v3019_v9 = vld [vmem:[%s3903_s1 + $0x240] sm:$0xff]  }
  0x16   :  { %2609 = vmatprep.subr.bf16.mxu1 %v2971_v22  ;;  %v3012_v1 = vld [vmem:[%s3903_s1 + $0x1b0] sm:$0xff]   ;;  %v3014_v3 = vld [vmem:[%s3903_s1 + $0x138] sm:$0xff]   ;;  %v3022_v13 = vld [vmem:[%s3903_s1 + $0x200] sm:$0xff]  }
  0x17   :  { %2588 = vmatpush3.bf16.msra.mxu0 %v2970_v21  ;;  %v3015_v4 = vld [vmem:[%s3903_s1 + $0x1f8] sm:$0xff]   ;;  %v23_v5 = vld [vmem:[%s3904_s0 + $0x10] sm:$0xff]  ;;  %v3023_v14 = vld [vmem:[%s3903_s1 + $0x2c0] sm:$0xff]  }
  0x18   :  { %2589 = vmatprep.subr.bf16.mxu0 %v2973_v24  ;;  %v2355_v6 = vcombine.low %v23_v5, %v23_v5  ;;  %v2356_v7 = vcombine.high %v23_v5, %v23_v5  ;;  %v3018_v8 = vld [vmem:[%s3903_s1 + $0x1b8] sm:$0xff]   ;;  %v3024_v15 = vld [vmem:[%s3903_s1 + $0x280] sm:$0xff]   ;;  %v3025_v16 = vld [vmem:[%s3903_s1 + $0x248] sm:$0xff]  }
  0x19   :  { %2610 = vmatpush3.bf16.msra.mxu1 %v2972_v23  ;;  %v24_v10 = vld [vmem:[%s3904_s0 + $0x18] sm:$0xff]  ;;  %v3026_v17 = vld [vmem:[%s3903_s1 + $0x208] sm:$0xff]   ;;  %v3029_v20 = vld [vmem:[%s3903_s1 + $0x250] sm:$0xff]  }
  0x1a   :  { %2611 = vmatprep.subr.bf16.mxu1 %v2975_v26  ;;  %v2357_v11 = vcombine.low %v24_v10, %v24_v10  ;;  %v2358_v12 = vcombine.high %v24_v10, %v24_v10  ;;  %v3027_v18 = vld [vmem:[%s3903_s1 + $0x2c8] sm:$0xff]   ;;  %v3030_v21 = vld [vmem:[%s3903_s1 + $0x210] sm:$0xff]   ;;  %v3033_v24 = vld [vmem:[%s3903_s1 + $0x258] sm:$0xff]  }
  0x1b   :  { %2590 = vmatpush3.bf16.msra.mxu0 %v2974_v25  ;;  %v3028_v19 = vld [vmem:[%s3903_s1 + $0x288] sm:$0xff]   ;;  %v3031_v22 = vld [vmem:[%s3903_s1 + $0x2d0] sm:$0xff]   ;;  %v3034_v25 = vld [vmem:[%s3903_s1 + $0x218] sm:$0xff]  }
  0x1c   :  { %2591 = vmatprep.subr.bf16.mxu0 %v2977_v28  ;;  %v3032_v23 = vld [vmem:[%s3903_s1 + $0x290] sm:$0xff]   ;;  %v3035_v26 = vld [vmem:[%s3903_s1 + $0x2d8] sm:$0xff]   ;;  %v3037_v28 = vld [vmem:[%s3903_s1 + $0x260] sm:$0xff]  }
  0x1d   :  { %2612 = vmatpush3.bf16.msra.mxu1 %v2976_v27  ;;  %v3036_v27 = vld [vmem:[%s3903_s1 + $0x298] sm:$0xff]   ;;  %v3040_v31 = vld [vmem:[%s3903_s1 + $0x2a0] sm:$0xff]   ;;  %v3042_v33 = vld [vmem:[%s3903_s1 + $0x228] sm:$0xff]  }
  0x1e   :  { %2613 = vmatprep.subr.bf16.mxu1 %v2979_v30  ;;  %v3039_v30 = vld [vmem:[%s3903_s1 + $0x2e0] sm:$0xff]   ;;  %v3045_v36 = vld [vmem:[%s3903_s1 + $0x270] sm:$0xff]  }
  0x1f   :  { %2592 = vmatpush3.bf16.msra.mxu0 %v2978_v29  ;;  %v3038_v29 = vld [vmem:[%s3903_s1 + $0x220] sm:$0xff]   ;;  %v3047_v38 = vld [vmem:[%s3903_s1 + $0x2f0] sm:$0xff]  }
  0x20   :  { %2621 = vmatprep.subr.bf16.mxu0 %v2983_v35  ;;  %v3044_v35 = vld [vmem:[%s3903_s1 + $0x2a8] sm:$0xff]   ;;  %v3076_v5 = vld [vmem:[%s3903_s1 + $0x3a0] sm:$0xff]   ;;  %v3081_v10 = vld [vmem:[%s3903_s1 + $0x370] sm:$0xff]  }
  0x21   :  { %2614 = vmatpush3.bf16.msra.mxu1 %v2982_v34  ;;  %v3043_v34 = vld [vmem:[%s3903_s1 + $0x2e8] sm:$0xff]  }
  0x22   :  { %1762 = vmatmul.mubr.bf16.vlgmr.msra.gmra.mrb[0].mxu0 %v2351_v32  ;;  %2643 = vmatprep.subr.bf16.mxu1 %v2987_v40  ;;  %v3041_v32 = vld [vmem:[%s3903_s1 + $0x268] sm:$0xff]   ;;  %v3049_v40 = vld [vmem:[%s3903_s1 + $0x278] sm:$0xff]  }
  0x23   :  { %2622 = vmatpush3.bf16.msra.mxu0 %v2986_v39  ;;  %1841 = vmatprep.mubr.bf16.mxu0 %v2356_v7  ;;  %v3048_v39 = vld [vmem:[%s3903_s1 + $0x2b0] sm:$0xff]   ;;  %v3078_v7 = vld [vmem:[%s3903_s1 + $0x328] sm:$0xff]  }
  0x24   :  { %1802 = vmatmul.mubr.bf16.vlgmr.msra.gmra.mrb[0].mxu1 %v2353_v37  ;;  %2623 = vmatprep.subr.bf16.mxu0 %v2989_v42  ;;  %v3046_v37 = vld [vmem:[%s3903_s1 + $0x230] sm:$0xff]   ;;  %v3051_v42 = vld [vmem:[%s3903_s1 + $0x2f8] sm:$0xff]  }
  0x25   :  { %2644 = vmatpush3.bf16.msra.mxu1 %v2988_v41  ;;  %1881 = vmatprep.mubr.bf16.mxu1 %v2358_v12  ;;  %v3050_v41 = vld [vmem:[%s3903_s1 + $0x238] sm:$0xff]   ;;  %v3083_v12 = vld [vmem:[%s3903_s1 + $0x3f0] sm:$0xff]  }
  0x26   :  { %2645 = vmatprep.subr.bf16.mxu1 %v2991_v44 }
  0x27   :  { %2624 = vmatpush3.bf16.msra.mxu0 %v2990_v43  ;;  %v25_v43 = vld [vmem:[%s3904_s0 + $0x20] sm:$0xff] }
  0x28   :  { %2625 = vmatprep.subr.bf16.mxu0 %v2993_v46  ;;  %v2359_v44 = vcombine.low %v25_v43, %v25_v43  ;;  %v3054_v46 = vld [vmem:[%s3903_s1 + $0x2b8] sm:$0xff]  }
  0x29   :  { %2646 = vmatpush3.bf16.msra.mxu1 %v2992_v45  ;;  %v2360_v45 = vcombine.high %v25_v43, %v25_v43  ;;  %v3112_v43 = vld [vmem:[%s3903_s1 + $0x4a0] sm:$0xff]  }
  0x2a   :  { %2647 = vmatprep.subr.bf16.mxu1 %v2995_v48  ;;  %v26_v48 = vld [vmem:[%s3904_s0 + $0x28] sm:$0xff] }
  0x2b   :  { %2626 = vmatpush3.bf16.msra.mxu0 %v2994_v47  ;;  %v3055_v47 = vld [vmem:[%s3903_s1 + $0x340] sm:$0xff]  }
  0x2c   :  { %2627 = vmatprep.subr.bf16.mxu0 %v2997_v50  ;;  %v2362_v50 = vcombine.high %v26_v48, %v26_v48 }
  0x2d   :  { %2648 = vmatpush3.bf16.msra.mxu1 %v2996_v49  ;;  %v2361_v49 = vcombine.low %v26_v48, %v26_v48  ;;  %v3117_v48 = vld [vmem:[%s3903_s1 + $0x470] sm:$0xff]  }
  0x2e   :  { %2649 = vmatprep.subr.bf16.mxu1 %v2999_v52  ;;  %v3059_v52 = vld [vmem:[%s3903_s1 + $0x3c0] sm:$0xff]  }
  0x2f   :  { %2628 = vmatpush3.bf16.msra.mxu0 %v2998_v51  ;;  %v3058_v51 = vld [vmem:[%s3903_s1 + $0x300] sm:$0xff]  }
  0x30   :  { %2629 = vmatprep.subr.bf16.mxu0 %v3001_v54  ;;  %v3061_v54 = vld [vmem:[%s3903_s1 + $0x348] sm:$0xff]  }
  0x31   :  { %2650 = vmatpush3.bf16.msra.mxu1 %v3000_v53  ;;  %v3060_v53 = vld [vmem:[%s3903_s1 + $0x380] sm:$0xff]  }
  0x32   :  { %2651 = vmatprep.subr.bf16.mxu1 %v3003_v56  ;;  %v3063_v56 = vld [vmem:[%s3903_s1 + $0x3c8] sm:$0xff]  }
  0x33   :  { %2630 = vmatpush3.bf16.msra.mxu0 %v3002_v55  ;;  %v3062_v55 = vld [vmem:[%s3903_s1 + $0x308] sm:$0xff]  }
  0x34   :  { %2631 = vmatprep.subr.bf16.mxu0 %v3005_v58  ;;  %v3065_v58 = vld [vmem:[%s3903_s1 + $0x350] sm:$0xff]  }
  0x35   :  { %2652 = vmatpush3.bf16.msra.mxu1 %v3004_v57  ;;  %v3064_v57 = vld [vmem:[%s3903_s1 + $0x388] sm:$0xff]  }
  0x36   :  { %2653 = vmatprep.subr.bf16.mxu1 %v3007_v60  ;;  %v3067_v60 = vld [vmem:[%s3903_s1 + $0x3d0] sm:$0xff]  }
  0x37   :  { %2632 = vmatpush3.bf16.msra.mxu0 %v3006_v59  ;;  %v3066_v59 = vld [vmem:[%s3903_s1 + $0x310] sm:$0xff]  }
  0x38   :  { %2633 = vmatprep.subr.bf16.mxu0 %v3009_v62  ;;  %v3069_v62 = vld [vmem:[%s3903_s1 + $0x358] sm:$0xff]  }
  0x39   :  { %2654 = vmatpush3.bf16.msra.mxu1 %v3008_v61  ;;  %v3068_v61 = vld [vmem:[%s3903_s1 + $0x390] sm:$0xff]  }
  0x3a   :  { %2655 = vmatprep.subr.bf16.mxu1 %v3011_v0  ;;  %v3071_v0 = vld [vmem:[%s3903_s1 + $0x3d8] sm:$0xff]  }
  0x3b   :  { %2634 = vmatpush3.bf16.msra.mxu0 %v3010_v63  ;;  %v3070_v63 = vld [vmem:[%s3903_s1 + $0x318] sm:$0xff]  }
  0x3c   :  { %2635 = vmatprep.subr.bf16.mxu0 %v3013_v2  ;;  %v3073_v2 = vld [vmem:[%s3903_s1 + $0x360] sm:$0xff]  }
  0x3d   :  { %2656 = vmatpush3.bf16.msra.mxu1 %v3012_v1  ;;  %v3072_v1 = vld [vmem:[%s3903_s1 + $0x398] sm:$0xff]  }
  0x3e   :  { %2657 = vmatprep.subr.bf16.mxu1 %v3015_v4  ;;  %v3075_v4 = vld [vmem:[%s3903_s1 + $0x3e0] sm:$0xff]  }
  0x3f   :  { %2636 = vmatpush3.bf16.msra.mxu0 %v3014_v3  ;;  %v3074_v3 = vld [vmem:[%s3903_s1 + $0x320] sm:$0xff]  }
  0x40   :  { %2665 = vmatprep.subr.bf16.mxu0 %v3019_v9  ;;  %v3080_v9 = vld [vmem:[%s3903_s1 + $0x3a8] sm:$0xff]  }
  0x41   :  { %2658 = vmatpush3.bf16.msra.mxu1 %v3018_v8  ;;  %v3079_v8 = vld [vmem:[%s3903_s1 + $0x3e8] sm:$0xff]  }
  0x42   :  { %1842 = vmatmul.mubr.bf16.vlgmr.msra.gmra.mrb[4].mxu0 %v2355_v6  ;;  %2687 = vmatprep.subr.bf16.mxu1 %v3023_v14  ;;  %v3077_v6 = vld [vmem:[%s3903_s1 + $0x368] sm:$0xff]   ;;  %v3085_v14 = vld [vmem:[%s3903_s1 + $0x378] sm:$0xff]  }
  0x43   :  { %2666 = vmatpush3.bf16.msra.mxu0 %v3022_v13  ;;  %1921 = vmatprep.mubr.bf16.mxu0 %v2360_v45  ;;  %v3084_v13 = vld [vmem:[%s3903_s1 + $0x3b0] sm:$0xff]   ;;  %v3114_v45 = vld [vmem:[%s3903_s1 + $0x428] sm:$0xff]  }
  0x44   :  { %1882 = vmatmul.mubr.bf16.vlgmr.msra.gmra.mrb[4].mxu1 %v2357_v11  ;;  %2667 = vmatprep.subr.bf16.mxu0 %v3025_v16  ;;  %v3082_v11 = vld [vmem:[%s3903_s1 + $0x330] sm:$0xff]   ;;  %v3087_v16 = vld [vmem:[%s3903_s1 + $0x3f8] sm:$0xff]  }
  0x45   :  { %2688 = vmatpush3.bf16.msra.mxu1 %v3024_v15  ;;  %1961 = vmatprep.mubr.bf16.mxu1 %v2362_v50  ;;  %v3086_v15 = vld [vmem:[%s3903_s1 + $0x338] sm:$0xff]   ;;  %v3119_v50 = vld [vmem:[%s3903_s1 + $0x4f0] sm:$0xff]  }
  0x46   :  { %2689 = vmatprep.subr.bf16.mxu1 %v3027_v18 }
  0x47   :  { %2668 = vmatpush3.bf16.msra.mxu0 %v3026_v17  ;;  %v27_v17 = vld [vmem:[%s3904_s0 + $0x30] sm:$0xff] }
  0x48   :  { %2669 = vmatprep.subr.bf16.mxu0 %v3029_v20  ;;  %v2363_v18 = vcombine.low %v27_v17, %v27_v17  ;;  %v3090_v20 = vld [vmem:[%s3903_s1 + $0x3b8] sm:$0xff]  }
  0x49   :  { %2690 = vmatpush3.bf16.msra.mxu1 %v3028_v19  ;;  %v2364_v19 = vcombine.high %v27_v17, %v27_v17  ;;  %v3148_v17 = vld [vmem:[%s3903_s1 + $0x5a0] sm:$0xff]  }
  0x4a   :  { %2691 = vmatprep.subr.bf16.mxu1 %v3031_v22  ;;  %v28_v22 = vld [vmem:[%s3904_s0 + $0x38] sm:$0xff] }
  0x4b   :  { %2670 = vmatpush3.bf16.msra.mxu0 %v3030_v21  ;;  %v3091_v21 = vld [vmem:[%s3903_s1 + $0x440] sm:$0xff]  }
  0x4c   :  { %2671 = vmatprep.subr.bf16.mxu0 %v3033_v24  ;;  %v2366_v24 = vcombine.high %v28_v22, %v28_v22 }
  0x4d   :  { %2692 = vmatpush3.bf16.msra.mxu1 %v3032_v23  ;;  %v2365_v23 = vcombine.low %v28_v22, %v28_v22  ;;  %v3153_v22 = vld [vmem:[%s3903_s1 + $0x570] sm:$0xff]  }
  0x4e   :  { %2693 = vmatprep.subr.bf16.mxu1 %v3035_v26  ;;  %v3095_v26 = vld [vmem:[%s3903_s1 + $0x4c0] sm:$0xff]  }
  0x4f   :  { %2672 = vmatpush3.bf16.msra.mxu0 %v3034_v25  ;;  %v3094_v25 = vld [vmem:[%s3903_s1 + $0x400] sm:$0xff]  }
  0x50   :  { %2673 = vmatprep.subr.bf16.mxu0 %v3037_v28  ;;  %v3097_v28 = vld [vmem:[%s3903_s1 + $0x448] sm:$0xff]  }
  0x51   :  { %2694 = vmatpush3.bf16.msra.mxu1 %v3036_v27  ;;  %v3096_v27 = vld [vmem:[%s3903_s1 + $0x480] sm:$0xff]  }
  0x52   :  { %2695 = vmatprep.subr.bf16.mxu1 %v3039_v30  ;;  %v3099_v30 = vld [vmem:[%s3903_s1 + $0x4c8] sm:$0xff]  }
  0x53   :  { %2674 = vmatpush3.bf16.msra.mxu0 %v3038_v29  ;;  %v3098_v29 = vld [vmem:[%s3903_s1 + $0x408] sm:$0xff]  }
  0x54   :  { %2675 = vmatprep.subr.bf16.mxu0 %v3041_v32  ;;  %v3101_v32 = vld [vmem:[%s3903_s1 + $0x450] sm:$0xff]  }
  0x55   :  { %2696 = vmatpush3.bf16.msra.mxu1 %v3040_v31  ;;  %v3100_v31 = vld [vmem:[%s3903_s1 + $0x488] sm:$0xff]  }
  0x56   :  { %2697 = vmatprep.subr.bf16.mxu1 %v3043_v34  ;;  %v3103_v34 = vld [vmem:[%s3903_s1 + $0x4d0] sm:$0xff]  }
  0x57   :  { %2676 = vmatpush3.bf16.msra.mxu0 %v3042_v33  ;;  %v3102_v33 = vld [vmem:[%s3903_s1 + $0x410] sm:$0xff]  }
  0x58   :  { %2677 = vmatprep.subr.bf16.mxu0 %v3045_v36  ;;  %v3105_v36 = vld [vmem:[%s3903_s1 + $0x458] sm:$0xff]  }
  0x59   :  { %2698 = vmatpush3.bf16.msra.mxu1 %v3044_v35  ;;  %v3104_v35 = vld [vmem:[%s3903_s1 + $0x490] sm:$0xff]  }
  0x5a   :  { %2699 = vmatprep.subr.bf16.mxu1 %v3047_v38  ;;  %v3107_v38 = vld [vmem:[%s3903_s1 + $0x4d8] sm:$0xff]  }
  0x5b   :  { %2678 = vmatpush3.bf16.msra.mxu0 %v3046_v37  ;;  %v3106_v37 = vld [vmem:[%s3903_s1 + $0x418] sm:$0xff]  }
  0x5c   :  { %2679 = vmatprep.subr.bf16.mxu0 %v3049_v40  ;;  %v3109_v40 = vld [vmem:[%s3903_s1 + $0x460] sm:$0xff]  }
  0x5d   :  { %2700 = vmatpush3.bf16.msra.mxu1 %v3048_v39  ;;  %v3108_v39 = vld [vmem:[%s3903_s1 + $0x498] sm:$0xff]  }
  0x5e   :  { %2701 = vmatprep.subr.bf16.mxu1 %v3051_v42  ;;  %v3111_v42 = vld [vmem:[%s3903_s1 + $0x4e0] sm:$0xff]  }
  0x5f   :  { %2680 = vmatpush3.bf16.msra.mxu0 %v3050_v41  ;;  %v3110_v41 = vld [vmem:[%s3903_s1 + $0x420] sm:$0xff]  }
  0x60   :  { %2709 = vmatprep.subr.bf16.mxu0 %v3055_v47  ;;  %v3116_v47 = vld [vmem:[%s3903_s1 + $0x4a8] sm:$0xff]  }
  0x61   :  { %2702 = vmatpush3.bf16.msra.mxu1 %v3054_v46  ;;  %v3115_v46 = vld [vmem:[%s3903_s1 + $0x4e8] sm:$0xff]  }
  0x62   :  { %1922 = vmatmul.mubr.bf16.vlgmr.msra.gmra.mrb[8].mxu0 %v2359_v44  ;;  %2731 = vmatprep.subr.bf16.mxu1 %v3059_v52  ;;  %v3113_v44 = vld [vmem:[%s3903_s1 + $0x468] sm:$0xff]   ;;  %v3121_v52 = vld [vmem:[%s3903_s1 + $0x478] sm:$0xff]  }
  0x63   :  { %2710 = vmatpush3.bf16.msra.mxu0 %v3058_v51  ;;  %2001 = vmatprep.mubr.bf16.mxu0 %v2364_v19  ;;  %v3120_v51 = vld [vmem:[%s3903_s1 + $0x4b0] sm:$0xff]   ;;  %v3150_v19 = vld [vmem:[%s3903_s1 + $0x528] sm:$0xff]  }
  0x64   :  { %1962 = vmatmul.mubr.bf16.vlgmr.msra.gmra.mrb[8].mxu1 %v2361_v49  ;;  %2711 = vmatprep.subr.bf16.mxu0 %v3061_v54  ;;  %v3118_v49 = vld [vmem:[%s3903_s1 + $0x430] sm:$0xff]   ;;  %v3123_v54 = vld [vmem:[%s3903_s1 + $0x4f8] sm:$0xff]  }
  0x65   :  { %2732 = vmatpush3.bf16.msra.mxu1 %v3060_v53  ;;  %2041 = vmatprep.mubr.bf16.mxu1 %v2366_v24  ;;  %v3122_v53 = vld [vmem:[%s3903_s1 + $0x438] sm:$0xff]   ;;  %v3155_v24 = vld [vmem:[%s3903_s1 + $0x5f0] sm:$0xff]  }
  0x66   :  { %2733 = vmatprep.subr.bf16.mxu1 %v3063_v56 }
  0x67   :  { %2712 = vmatpush3.bf16.msra.mxu0 %v3062_v55  ;;  %v29_v55 = vld [vmem:[%s3904_s0 + $0x40] sm:$0xff] }
  0x68   :  { %2713 = vmatprep.subr.bf16.mxu0 %v3065_v58  ;;  %v2367_v56 = vcombine.low %v29_v55, %v29_v55  ;;  %v3126_v58 = vld [vmem:[%s3903_s1 + $0x4b8] sm:$0xff]  }
  0x69   :  { %2734 = vmatpush3.bf16.msra.mxu1 %v3064_v57  ;;  %v2368_v57 = vcombine.high %v29_v55, %v29_v55 }
  0x6a   :  { %2735 = vmatprep.subr.bf16.mxu1 %v3067_v60  ;;  %v30_v60 = vld [vmem:[%s3904_s0 + $0x48] sm:$0xff] }
  0x6b   :  { %2714 = vmatpush3.bf16.msra.mxu0 %v3066_v59  ;;  %v3127_v59 = vld [vmem:[%s3903_s1 + $0x540] sm:$0xff]  }
  0x6c   :  { %2715 = vmatprep.subr.bf16.mxu0 %v3069_v62  ;;  %v2370_v62 = vcombine.high %v30_v60, %v30_v60 }
  0x6d   :  { %2736 = vmatpush3.bf16.msra.mxu1 %v3068_v61  ;;  %v2369_v61 = vcombine.low %v30_v60, %v30_v60 }
  0x6e   :  { %2737 = vmatprep.subr.bf16.mxu1 %v3071_v0  ;;  %v3131_v0 = vld [vmem:[%s3903_s1 + $0x5c0] sm:$0xff]  }
  0x6f   :  { %2716 = vmatpush3.bf16.msra.mxu0 %v3070_v63  ;;  %v3130_v63 = vld [vmem:[%s3903_s1 + $0x500] sm:$0xff]  }
  0x70   :  { %2717 = vmatprep.subr.bf16.mxu0 %v3073_v2  ;;  %v3133_v2 = vld [vmem:[%s3903_s1 + $0x548] sm:$0xff]  }
  0x71   :  { %2738 = vmatpush3.bf16.msra.mxu1 %v3072_v1  ;;  %v3132_v1 = vld [vmem:[%s3903_s1 + $0x580] sm:$0xff]  }
  0x72   :  { %2739 = vmatprep.subr.bf16.mxu1 %v3075_v4  ;;  %v3135_v4 = vld [vmem:[%s3903_s1 + $0x5c8] sm:$0xff]  }
  0x73   :  { %2718 = vmatpush3.bf16.msra.mxu0 %v3074_v3  ;;  %v3134_v3 = vld [vmem:[%s3903_s1 + $0x508] sm:$0xff]  }
  0x74   :  { %2719 = vmatprep.subr.bf16.mxu0 %v3077_v6  ;;  %v3137_v6 = vld [vmem:[%s3903_s1 + $0x550] sm:$0xff]  }
  0x75   :  { %2740 = vmatpush3.bf16.msra.mxu1 %v3076_v5  ;;  %v3136_v5 = vld [vmem:[%s3903_s1 + $0x588] sm:$0xff]  }
  0x76   :  { %2741 = vmatprep.subr.bf16.mxu1 %v3079_v8  ;;  %v3139_v8 = vld [vmem:[%s3903_s1 + $0x5d0] sm:$0xff]  }
  0x77   :  { %2720 = vmatpush3.bf16.msra.mxu0 %v3078_v7  ;;  %v3138_v7 = vld [vmem:[%s3903_s1 + $0x510] sm:$0xff]  }
  0x78   :  { %2721 = vmatprep.subr.bf16.mxu0 %v3081_v10  ;;  %v3141_v10 = vld [vmem:[%s3903_s1 + $0x558] sm:$0xff]  }
  0x79   :  { %2742 = vmatpush3.bf16.msra.mxu1 %v3080_v9  ;;  %v3140_v9 = vld [vmem:[%s3903_s1 + $0x590] sm:$0xff]  }
  0x7a   :  { %2743 = vmatprep.subr.bf16.mxu1 %v3083_v12  ;;  %v3143_v12 = vld [vmem:[%s3903_s1 + $0x5d8] sm:$0xff]  }
  0x7b   :  { %2722 = vmatpush3.bf16.msra.mxu0 %v3082_v11  ;;  %v3142_v11 = vld [vmem:[%s3903_s1 + $0x518] sm:$0xff]  }
  0x7c   :  { %2723 = vmatprep.subr.bf16.mxu0 %v3085_v14  ;;  %v3145_v14 = vld [vmem:[%s3903_s1 + $0x560] sm:$0xff]  }
  0x7d   :  { %2744 = vmatpush3.bf16.msra.mxu1 %v3084_v13  ;;  %v3144_v13 = vld [vmem:[%s3903_s1 + $0x598] sm:$0xff]  }
  0x7e   :  { %2745 = vmatprep.subr.bf16.mxu1 %v3087_v16  ;;  %v3147_v16 = vld [vmem:[%s3903_s1 + $0x5e0] sm:$0xff]  }
  0x7f   :  { %2724 = vmatpush3.bf16.msra.mxu0 %v3086_v15  ;;  %v3146_v15 = vld [vmem:[%s3903_s1 + $0x520] sm:$0xff]  }
  0x80   :  { %2753 = vmatprep.subr.bf16.mxu0 %v3091_v21  ;;  %v3152_v21 = vld [vmem:[%s3903_s1 + $0x5a8] sm:$0xff]  }
  0x81   :  { %2746 = vmatpush3.bf16.msra.mxu1 %v3090_v20  ;;  %v3151_v20 = vld [vmem:[%s3903_s1 + $0x5e8] sm:$0xff]  }
  0x82   :  { %2002 = vmatmul.mubr.bf16.vlgmr.msra.gmra.mrb[12].mxu0 %v2363_v18  ;;  %2775 = vmatprep.subr.bf16.mxu1 %v3095_v26  ;;  %v3149_v18 = vld [vmem:[%s3903_s1 + $0x568] sm:$0xff]   ;;  %v3157_v26 = vld [vmem:[%s3903_s1 + $0x578] sm:$0xff]  }
  0x83   :  { %2754 = vmatpush3.bf16.msra.mxu0 %v3094_v25  ;;  %2081 = vmatprep.mubr.bf16.mxu0 %v2368_v57  ;;  %v3156_v25 = vld [vmem:[%s3903_s1 + $0x5b0] sm:$0xff]  }
  0x84   :  { %2042 = vmatmul.mubr.bf16.vlgmr.msra.gmra.mrb[12].mxu1 %v2365_v23  ;;  %2755 = vmatprep.subr.bf16.mxu0 %v3097_v28  ;;  %v3154_v23 = vld [vmem:[%s3903_s1 + $0x530] sm:$0xff]   ;;  %v3159_v28 = vld [vmem:[%s3903_s1 + $0x5f8] sm:$0xff]  }
  0x85   :  { %2776 = vmatpush3.bf16.msra.mxu1 %v3096_v27  ;;  %2121 = vmatprep.mubr.bf16.mxu1 %v2370_v62  ;;  %v3158_v27 = vld [vmem:[%s3903_s1 + $0x538] sm:$0xff]  }
  0x86   :  { %2777 = vmatprep.subr.bf16.mxu1 %v3099_v30 }
  0x87   :  { %2756 = vmatpush3.bf16.msra.mxu0 %v3098_v29  ;;  %v31_v29 = vld [vmem:[%s3904_s0 + $0x50] sm:$0xff] }
  0x88   :  { %2757 = vmatprep.subr.bf16.mxu0 %v3101_v32  ;;  %v2371_v30 = vcombine.low %v31_v29, %v31_v29  ;;  %v3162_v32 = vld [vmem:[%s3903_s1 + $0x5b8] sm:$0xff]  }
  0x89   :  { %2778 = vmatpush3.bf16.msra.mxu1 %v3100_v31  ;;  %v2372_v31 = vcombine.high %v31_v29, %v31_v29 }
  0x8a   :  { %2779 = vmatprep.subr.bf16.mxu1 %v3103_v34  ;;  %v3174_v34 = vmov 0.0  }
  0x8b   :  { %2758 = vmatpush3.bf16.msra.mxu0 %v3102_v33  ;;  %v32_v33 = vld [vmem:[%s3904_s0 + $0x58] sm:$0xff] }
  0x8c   :  { %2759 = vmatprep.subr.bf16.mxu0 %v3105_v36  ;;  %v2374_v36 = vcombine.high %v32_v33, %v32_v33 }
  0x8d   :  { %2780 = vmatpush3.bf16.msra.mxu1 %v3104_v35  ;;  %v2373_v35 = vcombine.low %v32_v33, %v32_v33 }
  0x8e   :  { %2781 = vmatprep.subr.bf16.mxu1 %v3107_v38  ;;  %v3166_v38 = vld [vmem:[%s3903_s1 + $0x608] sm:$0xff]  }
  0x8f   :  { %2760 = vmatpush3.bf16.msra.mxu0 %v3106_v37  ;;  %v3165_v37 = vld [vmem:[%s3903_s1 + $0x600] sm:$0xff]  }
  0x90   :  { %2761 = vmatprep.subr.bf16.mxu0 %v3109_v40  ;;  %v3168_v40 = vld [vmem:[%s3903_s1 + $0x618] sm:$0xff]  }
  0x91   :  { %2782 = vmatpush3.bf16.msra.mxu1 %v3108_v39  ;;  %v3167_v39 = vld [vmem:[%s3903_s1 + $0x610] sm:$0xff]  }
  0x92   :  { %2783 = vmatprep.subr.bf16.mxu1 %v3111_v42  ;;  %v3170_v42 = vld [vmem:[%s3903_s1 + $0x628] sm:$0xff]  }
  0x93   :  { %2762 = vmatpush3.bf16.msra.mxu0 %v3110_v41  ;;  %v3169_v41 = vld [vmem:[%s3903_s1 + $0x620] sm:$0xff]  }
  0x94   :  { %2763 = vmatprep.subr.bf16.mxu0 %v3113_v44  ;;  %v3172_v44 = vld [vmem:[%s3903_s1 + $0x638] sm:$0xff]  }
  0x95   :  { %2784 = vmatpush3.bf16.msra.mxu1 %v3112_v43  ;;  %v3171_v43 = vld [vmem:[%s3903_s1 + $0x630] sm:$0xff]  }
  0x96   :  { %2785 = vmatprep.subr.bf16.mxu1 %v3115_v46 }
  0x97   :  { %2764 = vmatpush3.bf16.msra.mxu0 %v3114_v45  ;;  %v3173_v45 = vld [vmem:[%s3904_s0 + $0x60] ss:$0 sps:$4 sm:$0xff]  }
  0x98   :  { %2765 = vmatprep.subr.bf16.mxu0 %v3117_v48 }
  0x99   :  { %2786 = vmatpush3.bf16.msra.mxu1 %v3116_v47  ;;  %v2350_v47 = vld [vmem:[%s3905_s2] ss:$0 sm:$0xff] }
  0x9a   :  { %2787 = vmatprep.subr.bf16.mxu1 %v3119_v50 }
  0x9b   :  { %2766 = vmatpush3.bf16.msra.mxu0 %v3118_v49 }
  0x9c   :  { %2767 = vmatprep.subr.bf16.mxu0 %v3121_v52 }
  0x9d   :  { %2788 = vmatpush3.bf16.msra.mxu1 %v3120_v51 }
  0x9e   :  { %2789 = vmatprep.subr.bf16.mxu1 %v3123_v54 }
  0x9f   :  { %2768 = vmatpush3.bf16.msra.mxu0 %v3122_v53 }
  0xa0   :  { %2797 = vmatprep.subr.bf16.mxu0 %v3127_v59 }
  0xa1   :  { %2790 = vmatpush3.bf16.msra.mxu1 %v3126_v58 }
  0xa2   :  { %2082 = vmatmul.mubr.bf16.vlgmr.msra.gmra.mrb[16].mxu0 %v2367_v56  ;;  %2819 = vmatprep.subr.bf16.mxu1 %v3131_v0 }
  0xa3   :  { %2798 = vmatpush3.bf16.msra.mxu0 %v3130_v63  ;;  %2161 = vmatprep.mubr.bf16.mxu0 %v2372_v31 }
  0xa4   :  { %2122 = vmatmul.mubr.bf16.vlgmr.msra.gmra.mrb[16].mxu1 %v2369_v61  ;;  %2799 = vmatprep.subr.bf16.mxu0 %v3133_v2 }
  0xa5   :  { %2820 = vmatpush3.bf16.msra.mxu1 %v3132_v1  ;;  %2201 = vmatprep.mubr.bf16.mxu1 %v2374_v36 }
  0xa6   :  { %2821 = vmatprep.subr.bf16.mxu1 %v3135_v4 }
  0xa7   :  { %2800 = vmatpush3.bf16.msra.mxu0 %v3134_v3 }
  0xa8   :  { %2801 = vmatprep.subr.bf16.mxu0 %v3137_v6 }
  0xa9   :  { %2822 = vmatpush3.bf16.msra.mxu1 %v3136_v5 }
  0xaa   :  { %2823 = vmatprep.subr.bf16.mxu1 %v3139_v8  ;;  %v2253_v8 = vld [vmem:[%s3906_s3 + $0x8] sm:$0xff] }
  0xab   :  { %2802 = vmatpush3.bf16.msra.mxu0 %v3138_v7  ;;  %v2252_v7 = vld [vmem:[%s3906_s3] sm:$0xff] }
  0xac   :  { %2803 = vmatprep.subr.bf16.mxu0 %v3141_v10  ;;  %v3176_v10 = vmov 0.0|0.0  }
  0xad   :  { %2824 = vmatpush3.bf16.msra.mxu1 %v3140_v9  ;;  %v2254_v9 = vld [vmem:[%s3906_s3 + $0x10] sm:$0xff] }
  0xae   :  { %2825 = vmatprep.subr.bf16.mxu1 %v3143_v12  ;;  %v2255_v12 = vld [vmem:[%s3906_s3 + $0x18] sm:$0xff] }
  0xaf   :  { %2804 = vmatpush3.bf16.msra.mxu0 %v3142_v11  ;;  %v2923_v11 = vpack.c.bf16 %v2253_v8, %v2252_v7 }
  0xb0   :  { %2805 = vmatprep.subr.bf16.mxu0 %v3145_v14  ;;  %v2256_v14 = vld [vmem:[%s3906_s3 + $0x20] sm:$0xff] }
  0xb1   :  { %2826 = vmatpush3.bf16.msra.mxu1 %v3144_v13  ;;  %v2926_v13 = vpack.c.bf16 %v2255_v12, %v2254_v9 }
  0xb2   :  { %2827 = vmatprep.subr.bf16.mxu1 %v3147_v16 }
  0xb3   :  { %2806 = vmatpush3.bf16.msra.mxu0 %v3146_v15  ;;  %v2257_v15 = vld [vmem:[%s3906_s3 + $0x28] sm:$0xff] }
  0xb4   :  { %2807 = vmatprep.subr.bf16.mxu0 %v3149_v18  ;;  %v2929_v16 = vpack.c.bf16 %v2257_v15, %v2256_v14  ;;  %v2259_v18 = vld [vmem:[%s3906_s3 + $0x38] sm:$0xff] }
  0xb5   :  { %2828 = vmatpush3.bf16.msra.mxu1 %v3148_v17  ;;  %v2258_v17 = vld [vmem:[%s3906_s3 + $0x30] sm:$0xff] }
  0xb6   :  { %2829 = vmatprep.subr.bf16.mxu1 %v3151_v20  ;;  %v2260_v20 = vld [vmem:[%s3906_s3 + $0x40] sm:$0xff] }
  0xb7   :  { %2808 = vmatpush3.bf16.msra.mxu0 %v3150_v19  ;;  %v2932_v19 = vpack.c.bf16 %v2259_v18, %v2258_v17 }
  0xb8   :  { %2809 = vmatprep.subr.bf16.mxu0 %v3153_v22 }
  0xb9   :  { %2830 = vmatpush3.bf16.msra.mxu1 %v3152_v21  ;;  %v2261_v21 = vld [vmem:[%s3906_s3 + $0x48] sm:$0xff] }
  0xba   :  { %2831 = vmatprep.subr.bf16.mxu1 %v3155_v24  ;;  %v2935_v22 = vpack.c.bf16 %v2261_v21, %v2260_v20  ;;  %v2263_v24 = vld [vmem:[%s3906_s3 + $0x58] sm:$0xff] }
  0xbb   :  { %2810 = vmatpush3.bf16.msra.mxu0 %v3154_v23  ;;  %v2262_v23 = vld [vmem:[%s3906_s3 + $0x50] sm:$0xff] }
  0xbc   :  { %2811 = vmatprep.subr.bf16.mxu0 %v3157_v26  ;;  %v2264_v26 = vld [vmem:[%s3906_s3 + $0x60] sm:$0xff] }
  0xbd   :  { %2832 = vmatpush3.bf16.msra.mxu1 %v3156_v25  ;;  %v2938_v25 = vpack.c.bf16 %v2263_v24, %v2262_v23  ;;  %v2576_v23 = vld [vmem:[%s3907_s4] ss:$0 sm:$0xff] }
  0xbe   :  { %2833 = vmatprep.subr.bf16.mxu1 %v3159_v28 }
  0xbf   :  { %2812 = vmatpush3.bf16.msra.mxu0 %v3158_v27  ;;  %v2265_v27 = vld [vmem:[%s3906_s3 + $0x68] sm:$0xff] }
  0xc0   :  { %2867 = vmatprep.subr.bf16.mxu0 %v3174_v34  ;;  %v2941_v28 = vpack.c.bf16 %v2265_v27, %v2264_v26 }
  0xc1   :  { %2834 = vmatpush3.bf16.msra.mxu1 %v3162_v32 }
  0xc2   :  { %2162 = vmatmul.mubr.bf16.vlgmr.msra.gmra.mrb[20].mxu0 %v2371_v30  ;;  %2922 = vmatprep.subr.bf16.mxu1 %v3176_v10 }
  0xc3   :  { %2868 = vmatpush3.bf16.msra.mxu0 %v3165_v37  ;;  %2883 = vmatprep.mubr.msk.bf16.mxu0 %vm3175_vm0, %v3174_v34 }
  0xc4   :  { %2202 = vmatmul.mubr.bf16.vlgmr.msra.gmra.mrb[20].mxu1 %v2373_v35  ;;  %2869 = vmatprep.subr.bf16.mxu0 %v3174_v34  ;;  %v2267_v35 = vld [vmem:[%s3906_s3 + $0x78] sm:$0xff] }
  0xc5   :  { %2919 = vmatprep.mubr.msk.f32.mxu1 %vm3175_vm0, %v3174_v34  ;;  %2924 = vmatpush3.bf16.msra.mxu1 %v2923_v11 }
  0xc6   :  { %2925 = vmatprep.subr.bf16.mxu1 %v3176_v10 }
  0xc7   :  { %2870 = vmatpush3.bf16.msra.mxu0 %v3166_v38 }
  0xc8   :  { %2871 = vmatprep.subr.bf16.mxu0 %v3174_v34 }
  0xc9   :  { %2927 = vmatpush3.bf16.msra.mxu1 %v2926_v13 }
  0xca   :  { %2928 = vmatprep.subr.bf16.mxu1 %v3176_v10 }
  0xcb   :  { %2872 = vmatpush3.bf16.msra.mxu0 %v3167_v39 }
  0xcc   :  { %2873 = vmatprep.subr.bf16.mxu0 %v3174_v34 }
  0xcd   :  { %2930 = vmatpush3.bf16.msra.mxu1 %v2929_v16 }
  0xce   :  { %2931 = vmatprep.subr.bf16.mxu1 %v3176_v10 }
  0xcf   :  { %2874 = vmatpush3.bf16.msra.mxu0 %v3168_v40 }
  0xd0   :  { %2875 = vmatprep.subr.bf16.mxu0 %v3174_v34 }
  0xd1   :  { %2933 = vmatpush3.bf16.msra.mxu1 %v2932_v19 }
  0xd2   :  { %2934 = vmatprep.subr.bf16.mxu1 %v3176_v10 }
  0xd3   :  { %2876 = vmatpush3.bf16.msra.mxu0 %v3169_v41 }
  0xd4   :  { %2877 = vmatprep.subr.bf16.mxu0 %v3174_v34 }
  0xd5   :  { %2936 = vmatpush3.bf16.msra.mxu1 %v2935_v22 }
  0xd6   :  { %2937 = vmatprep.subr.bf16.mxu1 %v3176_v10 }
  0xd7   :  { %2878 = vmatpush3.bf16.msra.mxu0 %v3170_v42 }
  0xd8   :  { %2879 = vmatprep.subr.bf16.mxu0 %v3174_v34 }
  0xd9   :  { %2939 = vmatpush3.bf16.msra.mxu1 %v2938_v25 }
  0xda   :  { %2940 = vmatprep.subr.bf16.mxu1 %v3176_v10 }
  0xdb   :  { %2880 = vmatpush3.bf16.msra.mxu0 %v3171_v43 }
  0xdc   :  { %2881 = vmatprep.subr.bf16.mxu0 %v3174_v34  ;;  %v2266_v34 = vld [vmem:[%s3906_s3 + $0x70] sm:$0xff] }
  0xdd   :  { %2942 = vmatpush3.bf16.msra.mxu1 %v2941_v28  ;;  %v2944_v38 = vpack.c.bf16 %v2267_v35, %v2266_v34 }
  0xde   :  { %2943 = vmatprep.subr.bf16.mxu1 %v3176_v10 }
  0xdf   :  { %2882 = vmatpush3.bf16.msra.mxu0 %v3172_v44 }
  0xe1   :  { %2945 = vmatpush3.bf16.msra.mxu1 %v2944_v38 }
  0xe2   :  { %2884 = vmatmul.mubr.bf16.vlgmr.msra.gmra.mrb[24].mxu0 %v3173_v45 }
  0xf5   :  { %v2593_v46 = vpop.f32.mrb[0].mxu0 }
  0xf6   :  { %v2594_v48 = vpop.f32.mrb[1].mxu0 }
  0xf7   :  { %v2595_v49 = vadd.f32 %v2594_v48, %v2593_v46  ;;  %v2596_v50 = vpop.f32.mrb[2].mxu0  ;;  %v2615_v51 = vpop.f32.mrb[0].mxu1 }
  0xf8   :  { %v2597_v52 = vpop.f32.mrb[3].mxu0  ;;  %v2616_v53 = vpop.f32.mrb[1].mxu1 }
  0xf9   :  { %v1764_v54 = vadd.f32 %v2595_v49, %v2350_v47  ;;  %v2617_v55 = vadd.f32 %v2616_v53, %v2615_v51  ;;  %v2618_v56 = vpop.f32.mrb[2].mxu1 }
  0xfa   :  { %v2619_v57 = vpop.f32.mrb[3].mxu1 }
  0xfb   :  { %v1804_v58 = vadd.f32 %v2617_v55, %v1764_v54 }
 0x115   :  { %v2637_v59 = vpop.f32.mrb[4].mxu0 }
 0x116   :  { %v2638_v60 = vpop.f32.mrb[5].mxu0 }
 0x117   :  { %v2639_v61 = vadd.f32 %v2638_v60, %v2637_v59  ;;  %v2640_v62 = vpop.f32.mrb[6].mxu0  ;;  %v2659_v63 = vpop.f32.mrb[4].mxu1 }
 0x118   :  { %v2641_v0 = vpop.f32.mrb[7].mxu0  ;;  %v2660_v2 = vpop.f32.mrb[5].mxu1 }
 0x119   :  { %v1844_v1 = vadd.f32 %v2639_v61, %v1804_v58  ;;  %v2661_v3 = vadd.f32 %v2660_v2, %v2659_v63  ;;  %v2662_v4 = vpop.f32.mrb[6].mxu1 }
 0x11a   :  { %v2663_v5 = vpop.f32.mrb[7].mxu1 }
 0x11b   :  { %v1884_v6 = vadd.f32 %v2661_v3, %v1844_v1 }
 0x135   :  { %v2681_v29 = vpop.f32.mrb[8].mxu0 }
 0x136   :  { %v2682_v30 = vpop.f32.mrb[9].mxu0 }
 0x137   :  { %v2683_v31 = vadd.f32 %v2682_v30, %v2681_v29  ;;  %v2684_v32 = vpop.f32.mrb[10].mxu0  ;;  %v2703_v33 = vpop.f32.mrb[8].mxu1 }
 0x138   :  { %v2685_v36 = vpop.f32.mrb[11].mxu0  ;;  %v2704_v37 = vpop.f32.mrb[9].mxu1 }
 0x139   :  { %v1924_v39 = vadd.f32 %v2683_v31, %v1884_v6  ;;  %v2705_v40 = vadd.f32 %v2704_v37, %v2703_v33  ;;  %v2706_v41 = vpop.f32.mrb[10].mxu1 }
 0x13a   :  { %v2707_v42 = vpop.f32.mrb[11].mxu1 }
 0x13b   :  { %v1964_v43 = vadd.f32 %v2705_v40, %v1924_v39 }
 0x155   :  { %v2725_v44 = vpop.f32.mrb[12].mxu0 }
 0x156   :  { %v2726_v45 = vpop.f32.mrb[13].mxu0 }
 0x157   :  { %v2727_v46 = vadd.f32 %v2726_v45, %v2725_v44  ;;  %v2728_v47 = vpop.f32.mrb[14].mxu0  ;;  %v2747_v48 = vpop.f32.mrb[12].mxu1 }
 0x158   :  { %v2729_v49 = vpop.f32.mrb[15].mxu0  ;;  %v2748_v50 = vpop.f32.mrb[13].mxu1 }
 0x159   :  { %v2004_v51 = vadd.f32 %v2727_v46, %v1964_v43  ;;  %v2749_v52 = vadd.f32 %v2748_v50, %v2747_v48  ;;  %v2750_v53 = vpop.f32.mrb[14].mxu1 }
 0x15a   :  { %v2751_v54 = vpop.f32.mrb[15].mxu1 }
 0x15b   :  { %v2044_v55 = vadd.f32 %v2749_v52, %v2004_v51 }
 0x175   :  { %v2769_v56 = vpop.f32.mrb[16].mxu0 }
 0x176   :  { %v2770_v57 = vpop.f32.mrb[17].mxu0 }
 0x177   :  { %v2771_v58 = vadd.f32 %v2770_v57, %v2769_v56  ;;  %v2772_v59 = vpop.f32.mrb[18].mxu0  ;;  %v2791_v60 = vpop.f32.mrb[16].mxu1 }
 0x178   :  { %v2773_v61 = vpop.f32.mrb[19].mxu0  ;;  %v2792_v63 = vpop.f32.mrb[17].mxu1 }
 0x179   :  { %v2084_v62 = vadd.f32 %v2771_v58, %v2044_v55  ;;  %v2793_v0 = vadd.f32 %v2792_v63, %v2791_v60  ;;  %v2794_v1 = vpop.f32.mrb[18].mxu1 }
 0x17a   :  { %v2795_v2 = vpop.f32.mrb[19].mxu1 }
 0x17b   :  { %v2124_v3 = vadd.f32 %v2793_v0, %v2084_v62 }
 0x195   :  { %v2813_v4 = vpop.f32.mrb[20].mxu0 }
 0x196   :  { %v2814_v5 = vpop.f32.mrb[21].mxu0 }
 0x197   :  { %v2815_v6 = vadd.f32 %v2814_v5, %v2813_v4  ;;  %v2816_v7 = vpop.f32.mrb[22].mxu0  ;;  %v2835_v8 = vpop.f32.mrb[20].mxu1 }
 0x198   :  { %v2817_v9 = vpop.f32.mrb[23].mxu0  ;;  %v2836_v10 = vpop.f32.mrb[21].mxu1 }
 0x199   :  { %v2164_v11 = vadd.f32 %v2815_v6, %v2124_v3  ;;  %v2837_v12 = vadd.f32 %v2836_v10, %v2835_v8  ;;  %v2838_v13 = vpop.f32.mrb[22].mxu1 }
 0x19a   :  { %v2839_v14 = vpop.f32.mrb[23].mxu1 }
 0x19b   :  { %v2204_v15 = vadd.f32 %v2837_v12, %v2164_v11 }
 0x1b5   :  { %v2243_v16 = vpop.f32.mrb[24].mxu0 }
 0x1b6   :  { %v2244_v17 = vadd.f32 %v2243_v16, %v2204_v15  ;;  %v2885_v18 = vpop.f32.mrb[25].mxu0 }
 0x1b7   :  { %v2246_v19 = vpop.f32.mrb[26].mxu0 }
 0x1b8   :  { %vm2249_vm1 = vcmp.gt.f32.partialorder %v2244_v17, 0.0  ;;  %v2250_v20 = vmul.f32 0.01, %v2244_v17  ;;  %v2886_v21 = vpop.f32.mrb[27].mxu0 }
 0x1ba   :  { %v2251_v22 = vsel %vm2249_vm1, %v2244_v17, %v2250_v20 }
 0x1bb   :  { %2920 = vmatmul.mubr.f32.vlgmr.msra.gmra.mrb[24].mxu1 %v2251_v22 }
 0x28e   :  { %v2341_v24 = vpop.f32.mrb[24].mxu1 }
 0x28f   :  { %v2342_v25 = vadd.f32 %v2576_v23, %v2341_v24  ;;  %v2921_v26 = vpop.f32.mrb[25].mxu1 }
 0x291   :  { %2345 = vst [vmem:[%s3908_s5] sm:$0xff] %v2342_v25 }

</bundles_post_ra>
